<compile_context>
chip_gen: v6e
topology: v6e:2x2x1
jax: 0.10.0
libtpu: 0.0.40
codegen_flags: <defaults>
</compile_context>

<pallas_src>
import functools

import jax
import jax.numpy as jnp
from jax import lax
from jax.experimental import pallas as pl
from jax.experimental.pallas import tpu as pltpu

LANES = 128
SUBLANES = 8
# (4096, 128) f32 block = 2 MiB; 2 inputs x 2 pipeline buffers = 8 MiB VMEM.
MAX_TILE_ROWS = 4096


def _enhanced_loss_kernel(pred_ref, targ_ref, o_ref, *,
                          alpha, beta, valid_rows, tile_rows,
                          tiles_per_chunk, needs_mask):
    """Accumulate sum(d^2 + alpha*|d| + beta*smoothl1(d)) into o_ref.

    o_ref is the (1, 8, 128) output block for this chunk; its BlockSpec index
    ignores the inner ('arbitrary') grid axis so it stays resident in VMEM and
    doubles as the accumulator (no separate scratch).
    """
    i = pl.program_id(1)

    @pl.when(i == 0)
    def _init():
        o_ref[...] = jnp.zeros_like(o_ref)

    def accumulate(d):
        ad = jnp.abs(d)
        sq = d * d
        # SmoothL1Loss (PyTorch default beta=1.0): 0.5*d^2 if |d| < 1 else |d| - 0.5
        hub = jnp.where(ad < 1.0, 0.5 * sq, ad - 0.5)
        vals = sq + alpha * ad + beta * hub
        # vreg-wise partial reduce (tile_rows,128) -> (8,128): cross-vreg VPU
        # adds only (no XLU); keeps the resident accumulator one vreg big.
        psum = vals.reshape(tile_rows // SUBLANES, SUBLANES, LANES).sum(axis=0)
        o_ref[...] += psum[None, :, :]

    d = pred_ref[...].astype(jnp.float32) - targ_ref[...].astype(jnp.float32)

    if needs_mask:
        # Only tiles whose logical row range spills past `valid_rows` (the
        # partial last tile and/or the overflow tile of the 2-way chunk split)
        # take the masked path; every full tile accumulates unmasked.
        logical_blk = pl.program_id(0) * tiles_per_chunk + i
        start_row = logical_blk * tile_rows
        is_edge = start_row + tile_rows > valid_rows

        @pl.when(jnp.logical_not(is_edge))
        def _full():
            accumulate(d)

        @pl.when(is_edge)
        def _edge():
            row_ids = start_row + lax.broadcasted_iota(
                jnp.int32, (tile_rows, LANES), 0)
            # Mask applied to d itself so unspecified edge-tile data cannot
            # leak through abs/square.
            accumulate(jnp.where(row_ids < valid_rows, d, 0.0))
    else:
        accumulate(d)


def enhanced_loss(pred, target, alpha=0.1, beta=0.05):
    """JAX/Pallas equivalent of EnhancedLoss.forward(pred, target) -> scalar."""
    assert pred.shape == target.shape
    n = pred.size  # static mean denominator (shared by MSE / L1 / SmoothL1)
    alpha = float(alpha)
    beta = float(beta)

    flat_p = jnp.ravel(pred)
    flat_t = jnp.ravel(target)

    # Kernel streams the multiple-of-(8*128) bulk; the tiny (<1024 element)
    # tail is a pure-JAX epilogue -- avoids full-tensor jnp.pad HBM copies.
    bulk_rows = (n // (SUBLANES * LANES)) * SUBLANES
    bulk_elems = bulk_rows * LANES

    def fused_sum(p, t):
        d = p.astype(jnp.float32) - t.astype(jnp.float32)
        ad = jnp.abs(d)
        sq = d * d
        hub = jnp.where(ad < 1.0, 0.5 * sq, ad - 0.5)
        return jnp.sum(sq + alpha * ad + beta * hub)

    if bulk_elems < n:
        tail_sum = fused_sum(flat_p[bulk_elems:], flat_t[bulk_elems:])
    else:
        tail_sum = jnp.float32(0.0)

    if bulk_rows == 0:
        # Input smaller than one (8,128) slab: pure-JAX path.
        return tail_sum * (1.0 / n)

    p2d = flat_p[:bulk_elems].reshape(bulk_rows, LANES)
    t2d = flat_t[:bulk_elems].reshape(bulk_rows, LANES)

    tile_rows = min(bulk_rows, MAX_TILE_ROWS)  # always a multiple of 8
    num_blocks = (bulk_rows + tile_rows - 1) // tile_rows

    # 2-way "parallel" outer axis: lets v7x spread the stream across both
    # TensorCores; on 1-TC chips (v5e/v6e) it just runs sequentially.
    num_chunks = 2 if num_blocks >= 2 else 1
    tiles_per_chunk = (num_blocks + num_chunks - 1) // num_chunks
    has_overflow = num_chunks * tiles_per_chunk > num_blocks
    has_partial = (bulk_rows % tile_rows) != 0
    needs_mask = has_overflow or has_partial

    if has_overflow:
        # The single overflow step re-reads a valid block (clamped index) and
        # is fully masked in-kernel, so it contributes exactly zero.
        def in_index_map(c, i):
            return (jnp.minimum(c * tiles_per_chunk + i, num_blocks - 1), 0)
    else:
        def in_index_map(c, i):
            return (c * tiles_per_chunk + i, 0)

    kernel = functools.partial(
        _enhanced_loss_kernel,
        alpha=alpha, beta=beta,
        valid_rows=bulk_rows, tile_rows=tile_rows,
        tiles_per_chunk=tiles_per_chunk, needs_mask=needs_mask,
    )

    partials = pl.pallas_call(
        kernel,
        out_shape=jax.ShapeDtypeStruct((num_chunks, SUBLANES, LANES),
                                       jnp.float32),
        grid_spec=pltpu.PrefetchScalarGridSpec(
            num_scalar_prefetch=0,
            grid=(num_chunks, tiles_per_chunk),
            in_specs=[
                pl.BlockSpec((tile_rows, LANES), in_index_map),
                pl.BlockSpec((tile_rows, LANES), in_index_map),
            ],
            out_specs=pl.BlockSpec((1, SUBLANES, LANES),
                                   lambda c, i: (c, 0, 0)),
        ),
        compiler_params=pltpu.CompilerParams(
            dimension_semantics=("parallel", "arbitrary"),
        ),
    )(p2d, t2d)

    # Tiny (num_chunks, 8, 128) final reduction + tail + mean scale in XLA.
    return (jnp.sum(partials) + tail_sum) * (1.0 / n)


def enhanced_loss_ref(pred, target, alpha=0.1, beta=0.05):
    """Pure-JAX reference matching PyTorch semantics."""
    p = pred.astype(jnp.float32)
    t = target.astype(jnp.float32)
    d = p - t
    ad = jnp.abs(d)
    mse = jnp.mean(d * d)
    l1 = jnp.mean(ad)
    huber = jnp.mean(jnp.where(ad < 1.0, 0.5 * d * d, ad - 0.5))
    return mse + alpha * l1 + beta * huber


if __name__ == "__main__":
    key = jax.random.PRNGKey(0)
    k1, k2 = jax.random.split(key)
    # Small shapes consistent with an image-regression loss: NCHW (2, 4, 16, 16).
    pred = jax.random.normal(k1, (2, 4, 16, 16), dtype=jnp.float32)
    target = jax.random.normal(k2, (2, 4, 16, 16), dtype=jnp.float32)

    loss = enhanced_loss(pred, target)
    jax.block_until_ready(loss)

    ref = enhanced_loss_ref(pred, target)
    assert jnp.allclose(loss, ref, rtol=1e-5, atol=1e-5), (loss, ref)
    print("KERNEL_OK")
</pallas_src>

<mosaic_0001>
module attributes {stable_mosaic.version = 11 : i64} {
  func.func @_enhanced_loss_kernel(%arg0: i32, %arg1: i32, %arg2: memref<16x128xf32, #tpu.memory_space<vmem>>, %arg3: memref<16x128xf32, #tpu.memory_space<vmem>>, %arg4: memref<1x8x128xf32, #tpu.memory_space<vmem>>) attributes {dimension_semantics = [#tpu.dimension_semantics<parallel>, #tpu.dimension_semantics<arbitrary>], iteration_bounds = array<i64: 1, 1>, scalar_prefetch = 0 : i64, scratch_operands = 0 : i64, tpu.core_type = #tpu.core_type<tc>, window_params = [{transform_indices = @transform_0, window_bounds = array<i64: 16, 128>}, {transform_indices = @transform_1, window_bounds = array<i64: 16, 128>}, {transform_indices = @transform_2, window_bounds = array<i64: 1, 8, 128>}]} {
    %c0_i32 = arith.constant 0 : i32
    %0 = arith.cmpi eq, %arg1, %c0_i32 : i32
    %1 = arith.extui %0 : i1 to i32
    %c0_i32_0 = arith.constant 0 : i32
    %2 = arith.cmpi ne, %1, %c0_i32_0 : i32
    scf.if %2 {
      %cst_15 = arith.constant 0.000000e+00 : f32
      %27 = vector.broadcast %cst_15 : f32 to vector<1x8x128xf32>
      %c0_16 = arith.constant 0 : index
      %c0_17 = arith.constant 0 : index
      %c0_18 = arith.constant 0 : index
      %28 = vector.load %arg4[%c0_16, %c0_17, %c0_18] : memref<1x8x128xf32, #tpu.memory_space<vmem>>, vector<1x8x128xf32>
      tpu.vector_store %arg4[%c0_16, %c0_17, %c0_18], %27 {strides = array<i32>} : memref<1x8x128xf32, #tpu.memory_space<vmem>>, vector<1x8x128xf32>,
    } else {
    }
    %c0 = arith.constant 0 : index
    %c0_1 = arith.constant 0 : index
    %3 = vector.load %arg2[%c0, %c0_1] : memref<16x128xf32, #tpu.memory_space<vmem>>, vector<16x128xf32>
    %c0_2 = arith.constant 0 : index
    %c0_3 = arith.constant 0 : index
    %4 = vector.load %arg3[%c0_2, %c0_3] : memref<16x128xf32, #tpu.memory_space<vmem>>, vector<16x128xf32>
    %5 = arith.subf %3, %4 : vector<16x128xf32>
    %6 = math.absf %5 : vector<16x128xf32>
    %7 = arith.mulf %5, %5 : vector<16x128xf32>
    %cst = arith.constant 1.000000e+00 : f32
    %8 = vector.broadcast %cst : f32 to vector<16x128xf32>
    %9 = arith.cmpf olt, %6, %8 : vector<16x128xf32>
    %cst_4 = arith.constant 5.000000e-01 : f32
    %10 = vector.broadcast %cst_4 : f32 to vector<16x128xf32>
    %11 = arith.mulf %10, %7 : vector<16x128xf32>
    %cst_5 = arith.constant 5.000000e-01 : f32
    %12 = vector.broadcast %cst_5 : f32 to vector<16x128xf32>
    %13 = arith.subf %6, %12 : vector<16x128xf32>
    %14 = arith.select %9, %11, %13 : vector<16x128xi1>, vector<16x128xf32>
    %cst_6 = arith.constant 1.000000e-01 : f32
    %15 = vector.broadcast %cst_6 : f32 to vector<16x128xf32>
    %16 = arith.mulf %15, %6 : vector<16x128xf32>
    %17 = arith.addf %7, %16 : vector<16x128xf32>
    %cst_7 = arith.constant 5.000000e-02 : f32
    %18 = vector.broadcast %cst_7 : f32 to vector<16x128xf32>
    %19 = arith.mulf %18, %14 : vector<16x128xf32>
    %20 = arith.addf %17, %19 : vector<16x128xf32>
    %21 = vector.shape_cast %20 : vector<16x128xf32> to vector<2x8x128xf32>
    %cst_8 = arith.constant dense<0.000000e+00> : vector<8x128xf32>
    %22 = vector.multi_reduction <add>, %21, %cst_8 [0] : vector<2x8x128xf32> to vector<8x128xf32>
    %c0_9 = arith.constant 0 : index
    %c0_10 = arith.constant 0 : index
    %c0_11 = arith.constant 0 : index
    %23 = vector.load %arg4[%c0_9, %c0_10, %c0_11] : memref<1x8x128xf32, #tpu.memory_space<vmem>>, vector<1x8x128xf32>
    %24 = vector.shape_cast %22 : vector<8x128xf32> to vector<1x8x128xf32>
    %25 = arith.addf %23, %24 : vector<1x8x128xf32>
    %c0_12 = arith.constant 0 : index
    %c0_13 = arith.constant 0 : index
    %c0_14 = arith.constant 0 : index
    %26 = vector.load %arg4[%c0_12, %c0_13, %c0_14] : memref<1x8x128xf32, #tpu.memory_space<vmem>>, vector<1x8x128xf32>
    tpu.vector_store %arg4[%c0_12, %c0_13, %c0_14], %25 {strides = array<i32>} : memref<1x8x128xf32, #tpu.memory_space<vmem>>, vector<1x8x128xf32>,
    return
  }
  func.func @transform_0(%arg0: i32, %arg1: i32) -> (i32, i32) {
    %c1_i32 = arith.constant 1 : i32
    %0 = arith.muli %arg0, %c1_i32 : i32
    %1 = arith.addi %0, %arg1 : i32
    %c0_i32 = arith.constant 0 : i32
    %c0_i32_0 = arith.constant 0 : i32
    return %1, %c0_i32 : i32, i32
  }
  func.func @transform_1(%arg0: i32, %arg1: i32) -> (i32, i32) {
    %c1_i32 = arith.constant 1 : i32
    %0 = arith.muli %arg0, %c1_i32 : i32
    %1 = arith.addi %0, %arg1 : i32
    %c0_i32 = arith.constant 0 : i32
    %c0_i32_0 = arith.constant 0 : i32
    return %1, %c0_i32 : i32, i32
  }
  func.func @transform_2(%arg0: i32, %arg1: i32) -> (i32, i32, i32) {
    %c0_i32 = arith.constant 0 : i32
    %c0_i32_0 = arith.constant 0 : i32
    %c0_i32_1 = arith.constant 0 : i32
    return %arg0, %c0_i32, %c0_i32_0 : i32, i32, i32
  }
}

</mosaic_0001>

<bundles_post_ra>
// kernel: tpu_custom_call.1
= control target key start
LH: loop header
LB: loop body
LE: loop exit
PB: predicated region body
PF: predicated region fallthrough
CT: control target
= control target key end

     0   :  { %7 = vsyncpa [#allocation3], 0  ;;  %s206_s0 = inlined_call_operand.hbm [shape: f32[16,128], index: 0, kind: input, shape index: {}]   ;;  %s207_s1 = inlined_call_operand.hbm [shape: f32[16,128], index: 1, kind: input, shape index: {}]   ;;  %s208_s2 = inlined_call_operand.hbm [shape: f32[1,8,128], index: 2, kind: output, shape index: {}]  }
   0x1   :  { %8 = vsyncpa [#allocation6], 0 }
   0x2   :  { %9 = vsyncpa [#allocation4], 0  ;;  %s177_s9 = smov [#allocation2]  }
   0x3   :  { %s19_s10 = sshll.u32 %s177_s9, 4  ;;  %s20_s10 = int_to_ptr.vmem [resolvable:$true] %s19_s10 }
   0x4   :  { %s119_s11 = scalar_lea.vmem %s20_s10, 256  ;;  %p124_p1 = scmp.lt.s32.totalorder %s20_s10, %s20_s10 }
   0x5   :  { %p120_p0 = scmp.ne.s32.totalorder %s20_s10, %s119_s11  ;;  %p125_p2 = scmp.lt.s32.totalorder %s119_s11, %s119_s11 }
   0x7   :  { %p126_p3 = por %p125_p2, %p124_p1 }
   0x9   :  { %p127_p4 = pnand %p126_p3, %p120_p0 }
   0xb   :  { %130 = shalt.err (!%p127_p4)
}
   0xc   :  { %s178_s12 = smov 128   ;;  %s179_s13 = smov 8  }
   0xd   :  { %25 = dma.hbm_to_vmem [thread:$0]  %s206_s0, 256, %s20_s10, [#allocation3], %s178_s12, %s178_s12, %s179_s13  }
   0xe   :  { %s180_s16 = smov [#allocation5]  }
   0xf   :  { %s35_s17 = sshll.u32 %s180_s16, 4  ;;  %s36_s17 = int_to_ptr.vmem [resolvable:$true] %s35_s17 }
  0x10   :  { %s139_s18 = scalar_lea.vmem %s36_s17, 256  ;;  %p144_p6 = scmp.lt.s32.totalorder %s36_s17, %s36_s17 }
  0x11   :  { %p140_p5 = scmp.ne.s32.totalorder %s36_s17, %s139_s18  ;;  %p145_p7 = scmp.lt.s32.totalorder %s139_s18, %s139_s18 }
  0x13   :  { %p146_p8 = por %p145_p7, %p144_p6 }
  0x15   :  { %p147_p9 = pnand %p146_p8, %p140_p5 }
  0x17   :  { %150 = shalt.err (!%p147_p9)
}
  0x18   :  { %41 = dma.hbm_to_vmem [thread:$0]  %s207_s1, 256, %s36_s17, [#allocation6], %s178_s12, %s178_s12, %s179_s13  }
  0x19   :  { %171 = dma.done.wait [#allocation3], 256  }
  0x1a   :  { %172 = vsyncadd [#allocation3], 4294967040 }
  0x1b   :  { %173 = dma.done.wait [#allocation6], 256  }
  0x1c   :  { %174 = vsyncadd [#allocation6], 4294967040  ;;  %v57_v0 = vld [vmem:[#allocation2] sm:$0xff]  ;;  %v58_v1 = vld [vmem:[#allocation2 + $0x8] sm:$0xff]  ;;  %s181_s0 = smov [#allocation7]  }
  0x1d   :  { %v59_v2 = vld [vmem:[#allocation5] sm:$0xff]  ;;  %v60_v3 = vld [vmem:[#allocation5 + $0x8] sm:$0xff]  ;;  %s93_s1 = sshll.u32 %s181_s0, 4  ;;  %s94_s1 = int_to_ptr.vmem [resolvable:$true] %s93_s1 }
  0x1e   :  { %v61_v4 = vsub.f32 %v57_v0, %v59_v2  ;;  %v62_v5 = vsub.f32 %v58_v1, %v60_v3  ;;  %s151_s21 = scalar_lea.vmem %s94_s1, 128  ;;  %p156_p11 = scmp.lt.s32.totalorder %s94_s1, %s94_s1 }
  0x1f   :  { %p152_p10 = scmp.ne.s32.totalorder %s94_s1, %s151_s21  ;;  %p157_p12 = scmp.lt.s32.totalorder %s151_s21, %s151_s21 }
  0x20   :  { %v63_v6 = vand.u32 2147483647, %v61_v4  ;;  %v65_v7 = vmul.f32 %v61_v4, %v61_v4  ;;  %v64_v8 = vand.u32 2147483647, %v62_v5  ;;  %v66_v9 = vmul.f32 %v62_v5, %v62_v5 }
  0x21   :  { %p158_p13 = por %p157_p12, %p156_p11 }
  0x22   :  { %vm67_vm0 = vcmp.lt.f32.partialorder %v63_v6, 1.0  ;;  %v69_v10 = vmul.f32 0.5, %v65_v7  ;;  %v103_v11 = vadd.f32 -0.5, %v63_v6  ;;  %v75_v12 = vmul.f32 0.1, %v63_v6 }
  0x23   :  { %vm68_vm1 = vcmp.lt.f32.partialorder %v64_v8, 1.0  ;;  %v70_v13 = vmul.f32 0.5, %v66_v9  ;;  %v104_v14 = vadd.f32 -0.5, %v64_v8  ;;  %v76_v15 = vmul.f32 0.1, %v64_v8  ;;  %p159_p0 = pnand %p158_p13, %p152_p10 }
  0x24   :  { %v73_v16 = vsel %vm67_vm0, %v69_v10, %v103_v11  ;;  %v77_v17 = vadd.f32 %v75_v12, %v65_v7 }
  0x25   :  { %v74_v18 = vsel %vm68_vm1, %v70_v13, %v104_v14  ;;  %v78_v19 = vadd.f32 %v76_v15, %v66_v9  ;;  %v79_v20 = vmul.f32 0.05, %v73_v16 }
  0x26   :  { %v80_v21 = vmul.f32 0.05, %v74_v18 }
  0x27   :  { %v81_v22 = vadd.f32 %v79_v20, %v77_v17 }
  0x28   :  { %v82_v23 = vadd.f32 %v80_v21, %v78_v19 }
  0x2a   :  { %v83_v24 = vadd.f32 %v82_v23, %v81_v22 }
  0x2c   :  { %86 = vst [vmem:[#allocation7] sm:$0xff] %v83_v24 }
  0x2d   :  { %162 = shalt.err (!%p159_p0)
}
  0x2e   :  { %96 = dma.vmem_to_hbm [thread:$0]  %s94_s1, 128, %s208_s2, [#allocation4]  }
  0x2f   :  { %175 = dma.done.wait [#allocation4], 128  }
  0x30   :  { %176 = vsyncadd [#allocation4], 4294967168 }
  0x31   :  { %100 = vsyncpa [#allocation3], 1 }
  0x32   :  { %101 = vsyncpa [#allocation6], 1 }
  0x33   :  { %102 = vsyncpa [#allocation4], 1 }

</bundles_post_ra>
